<compile_context>
chip_gen: v7x
topology: tpu7x:2x2x1
jax: 0.10.0
libtpu: 0.0.40
codegen_flags: <defaults>
</compile_context>

<pallas_src>
import functools

import jax
import jax.numpy as jnp
import numpy as np
from jax.experimental import pallas as pl
from jax.experimental.pallas import tpu as pltpu


def _round_up(n: int, m: int) -> int:
    return ((n + m - 1) // m) * m


def _vmem_capacity_bytes() -> int:
    """Physical VMEM per core; conservative (v7x-sized) fallback if unknown."""
    try:
        info = pltpu.get_tpu_info()
        cap = getattr(info, "vmem_capacity_bytes", None)
        if cap:
            return int(cap)
    except Exception:
        pass
    return 64 * 1024 * 1024


def _pick_time_tile(L: int) -> int:
    """Output time-tile: ~256, a multiple of 8, and an exact divisor of L.

    Falling back to tl == L keeps the kernel correct for awkward L (e.g. odd);
    typical time-series lengths are multiples of 8 so the band path is used.
    """
    if L <= 256 or L % 8 != 0:
        return L
    for tl in range(256, 7, -8):
        if L % tl == 0:
            return tl
    return L


def _step_vmem_bytes(L, tl, width, td, itemsize, n_split) -> int:
    """Honest per-grid-step VMEM estimate (double-buffered blocks + temporaries)."""
    blocks = 2 * (L * td + 2 * tl * td) * itemsize          # in + 2 out, 2 buffers
    temps = (4 * tl * width * 4                              # iota / counts / bf16 weights
             + (4 + 2 * n_split) * width * td                # f32 band + bf16 split pieces
             + 8 * tl * td)                                  # f32 accumulator + mean
    return blocks + temps


def _pick_channel_tile(D, L, tl, width, itemsize, n_split, budget) -> int:
    """Lane (channel) tile: full D when D<=128 (masked stores beat extra HBM
    passes); otherwise the largest 128-multiple that fits the VMEM budget."""
    if D <= 128:
        return D
    for td in (512, 256, 128):
        if D % td == 0 and _step_vmem_bytes(L, tl, width, td, itemsize, n_split) <= budget:
            return td
    return 128


def _decomp_kernel(x_ref, res_ref, mean_ref, *, L, k, p, tl, width, n_split):
    # x_ref:    (1, L, td)   full sequence for this (batch, channel-tile)
    # res_ref:  (1, tl, td)  output time-tile
    # mean_ref: (1, tl, td)
    t = pl.program_id(2)
    t0 = t * tl
    if tl % 8 == 0:
        t0 = pl.multiple_of(t0, 8)
    # Source band covering every nonzero-weight row for this output tile.
    start = jnp.clip(t0 - p, 0, L - width)
    xb = x_ref[0, pl.ds(start, width), :]                    # (width, td), input dtype

    # Replicate-pad averaging counts, generated on the VPU (free filler under DMA):
    # counts[i, j] = #{window positions of output time t0+i that map, after edge
    # replication, onto source time start+j}.  Rows sum to k exactly.
    ti = t0 + jax.lax.broadcasted_iota(jnp.int32, (tl, width), 0)      # output time
    sj = start + jax.lax.broadcasted_iota(jnp.int32, (tl, width), 1)   # source time
    counts = (jnp.abs(ti - sj) <= p).astype(jnp.int32)
    counts = counts + jnp.where(sj == 0, jnp.maximum(p - ti, 0), 0)
    counts = counts + jnp.where(sj == L - 1, jnp.maximum(ti + p - (L - 1), 0), 0)
    wb = counts.astype(jnp.bfloat16)          # small integers -> exact in bf16

    # Band matmul: single-pass bf16 MXU with f32 accumulation.  For f32 inputs,
    # split x into n_split bf16 pieces (weights are exact, so only x needs it).
    if n_split == 1:
        acc = jnp.dot(wb, xb.astype(jnp.bfloat16), preferred_element_type=jnp.float32)
    else:
        rem = xb.astype(jnp.float32)
        pieces = []
        for s in range(n_split):
            piece = rem.astype(jnp.bfloat16)
            pieces.append(piece)
            if s + 1 < n_split:
                rem = rem - piece.astype(jnp.float32)
        acc = jnp.dot(wb, pieces[0], preferred_element_type=jnp.float32)
        for piece in pieces[1:]:
            acc = acc + jnp.dot(wb, piece, preferred_element_type=jnp.float32)
    mean = acc * (1.0 / k)

    # Output-aligned x rows (tl | L, so this slice is always in bounds).
    x_tile = xb if tl == L else x_ref[0, pl.ds(t0, tl), :]
    mean_o = mean.astype(mean_ref.dtype)
    mean_ref[0] = mean_o
    res_ref[0] = (x_tile - mean_o.astype(x_tile.dtype)).astype(res_ref.dtype)


def series_decomposition(x: jax.Array, kernel_size: int):
    """Pallas implementation of SeriesDecomposition.forward.

    Args:
      x: (B, L, D) array  (batch, seq_len, features).
      kernel_size: odd moving-average window size.
    Returns:
      (res, moving_mean), both (B, L, D) in x.dtype.
    """
    if kernel_size % 2 != 1 or kernel_size < 1:
        raise ValueError("kernel_size must be a positive odd integer (the PyTorch "
                         "module's residual subtraction requires it).")
    B, L, D = x.shape
    k = kernel_size
    p = (k - 1) // 2
    itemsize = jnp.dtype(x.dtype).itemsize
    n_split = 1 if x.dtype == jnp.bfloat16 else 3    # bf16_3x-style split for f32/f16

    tl = _pick_time_tile(L)                          # output time tile (divides L)
    width = min(_round_up(tl + 2 * p, 8), L)         # source band per output tile

    vmem_cap = _vmem_capacity_bytes()
    td = _pick_channel_tile(D, L, tl, width, itemsize, n_split,
                            budget=int(0.4 * vmem_cap))
    est = _step_vmem_bytes(L, tl, width, td, itemsize, n_split) + (2 << 20)
    vmem_limit = int(min(max(est, 32 * 1024 * 1024), int(0.75 * vmem_cap)))

    # NOTE: the full-L x block stays resident in VMEM across the inner time-grid
    # axis, so x is read from HBM once per (batch, channel-tile).  For extremely
    # long sequences (L*td*itemsize approaching VMEM) the x block itself would
    # need a haloed time split; typical decomposition lengths are far below that.
    grid = (B, pl.cdiv(D, td), L // tl)

    kernel = functools.partial(_decomp_kernel, L=L, k=k, p=p, tl=tl,
                               width=width, n_split=n_split)
    res, mean = pl.pallas_call(
        kernel,
        out_shape=(jax.ShapeDtypeStruct((B, L, D), x.dtype),
                   jax.ShapeDtypeStruct((B, L, D), x.dtype)),
        grid=grid,
        in_specs=[pl.BlockSpec((1, L, td), lambda b, d, t: (b, 0, d))],
        out_specs=(pl.BlockSpec((1, tl, td), lambda b, d, t: (b, t, d)),
                   pl.BlockSpec((1, tl, td), lambda b, d, t: (b, t, d))),
        compiler_params=pltpu.CompilerParams(
            dimension_semantics=("parallel", "parallel", "arbitrary"),
            vmem_limit_bytes=vmem_limit),
    )(x)
    return res, mean


def _reference(x: jax.Array, kernel_size: int):
    """Pure-JAX reference mirroring the PyTorch semantics."""
    p = (kernel_size - 1) // 2
    front = jnp.repeat(x[:, 0:1, :], p, axis=1)
    end = jnp.repeat(x[:, -1:, :], p, axis=1)
    padded = jnp.concatenate([front, x, end], axis=1)          # (B, L+2p, D)
    L = x.shape[1]
    mean = sum(padded[:, i:i + L, :] for i in range(kernel_size)) / kernel_size
    return x - mean, mean


def _check(x, kernel_size):
    res, mean = series_decomposition(x, kernel_size)
    jax.block_until_ready(res)
    jax.block_until_ready(mean)
    res_ref, mean_ref = _reference(x, kernel_size)
    np.testing.assert_allclose(np.asarray(mean), np.asarray(mean_ref),
                               rtol=1e-5, atol=1e-5)
    np.testing.assert_allclose(np.asarray(res), np.asarray(res_ref),
                               rtol=1e-5, atol=1e-5)


if __name__ == "__main__":
    kernel_size = 5
    key = jax.random.PRNGKey(0)
    k1, k2, k3 = jax.random.split(key, 3)

    # Small channel count -> channels-on-lanes with masked stores, single time tile.
    _check(jax.random.normal(k1, (2, 16, 8), dtype=jnp.float32), kernel_size)

    # Wide channel count -> lane-dense (multiple-of-128) stores.
    _check(jax.random.normal(k2, (2, 32, 256), dtype=jnp.float32), kernel_size)

    # Longer sequence -> exercises the banded time-tiled path (tl < L, dynamic band start).
    _check(jax.random.normal(k3, (2, 512, 8), dtype=jnp.float32), kernel_size)

    print("KERNEL_OK")
</pallas_src>

<mosaic_0001>
module attributes {stable_mosaic.version = 11 : i64} {
  func.func @_decomp_kernel(%arg0: i32, %arg1: i32, %arg2: i32, %arg3: memref<1x16x8xf32, #tpu.memory_space<vmem>>, %arg4: memref<1x16x8xf32, #tpu.memory_space<vmem>>, %arg5: memref<1x16x8xf32, #tpu.memory_space<vmem>>) attributes {dimension_semantics = [#tpu.dimension_semantics<parallel>, #tpu.dimension_semantics<parallel>, #tpu.dimension_semantics<arbitrary>], iteration_bounds = array<i64: 2, 1, 1>, scalar_prefetch = 0 : i64, scratch_operands = 0 : i64, tpu.core_type = #tpu.core_type<tc>, window_params = [{transform_indices = @transform_0, window_bounds = array<i64: 1, 16, 8>}, {transform_indices = @transform_1, window_bounds = array<i64: 1, 16, 8>}, {transform_indices = @transform_2, window_bounds = array<i64: 1, 16, 8>}]} {
    %c16_i32 = arith.constant 16 : i32
    %0 = arith.muli %arg2, %c16_i32 : i32
    %1 = tpu.assume_multiple %0, 8 : i32
    %c2_i32 = arith.constant 2 : i32
    %2 = arith.subi %1, %c2_i32 : i32
    %c0_i32 = arith.constant 0 : i32
    %c0_i32_0 = arith.constant 0 : i32
    %3 = arith.maxsi %c0_i32, %2 : i32
    %4 = arith.minsi %c0_i32_0, %3 : i32
    %c0 = arith.constant 0 : index
    %5 = arith.index_cast %4 : i32 to index
    %c0_1 = arith.constant 0 : index
    %6 = vector.load %arg3[%c0, %5, %c0_1] : memref<1x16x8xf32, #tpu.memory_space<vmem>>, vector<1x16x8xf32>
    %7 = vector.shape_cast %6 : vector<1x16x8xf32> to vector<16x8xf32>
    %8 = tpu.iota {dimensions = array<i32: 0>} : vector<16x16xi32>
    %9 = vector.broadcast %1 : i32 to vector<16x16xi32>
    %10 = arith.addi %9, %8 : vector<16x16xi32>
    %11 = tpu.iota {dimensions = array<i32: 1>} : vector<16x16xi32>
    %12 = vector.broadcast %4 : i32 to vector<16x16xi32>
    %13 = arith.addi %12, %11 : vector<16x16xi32>
    %14 = arith.subi %10, %13 : vector<16x16xi32>
    %15 = math.absi %14 : vector<16x16xi32>
    %c2_i32_2 = arith.constant 2 : i32
    %16 = vector.broadcast %c2_i32_2 : i32 to vector<16x16xi32>
    %17 = arith.cmpi sle, %15, %16 : vector<16x16xi32>
    %18 = arith.extui %17 : vector<16x16xi1> to vector<16x16xi32>
    %c0_i32_3 = arith.constant 0 : i32
    %19 = vector.broadcast %c0_i32_3 : i32 to vector<16x16xi32>
    %20 = arith.cmpi eq, %13, %19 : vector<16x16xi32>
    %c2_i32_4 = arith.constant 2 : i32
    %21 = vector.broadcast %c2_i32_4 : i32 to vector<16x16xi32>
    %22 = arith.subi %21, %10 : vector<16x16xi32>
    %c0_i32_5 = arith.constant 0 : i32
    %23 = vector.broadcast %c0_i32_5 : i32 to vector<16x16xi32>
    %24 = arith.maxsi %22, %23 : vector<16x16xi32>
    %c0_i32_6 = arith.constant 0 : i32
    %25 = vector.broadcast %c0_i32_6 : i32 to vector<16x16xi32>
    %26 = arith.select %20, %24, %25 : vector<16x16xi1>, vector<16x16xi32>
    %27 = arith.addi %18, %26 : vector<16x16xi32>
    %c15_i32 = arith.constant 15 : i32
    %28 = vector.broadcast %c15_i32 : i32 to vector<16x16xi32>
    %29 = arith.cmpi eq, %13, %28 : vector<16x16xi32>
    %c2_i32_7 = arith.constant 2 : i32
    %30 = vector.broadcast %c2_i32_7 : i32 to vector<16x16xi32>
    %31 = arith.addi %10, %30 : vector<16x16xi32>
    %c15_i32_8 = arith.constant 15 : i32
    %32 = vector.broadcast %c15_i32_8 : i32 to vector<16x16xi32>
    %33 = arith.subi %31, %32 : vector<16x16xi32>
    %c0_i32_9 = arith.constant 0 : i32
    %34 = vector.broadcast %c0_i32_9 : i32 to vector<16x16xi32>
    %35 = arith.maxsi %33, %34 : vector<16x16xi32>
    %c0_i32_10 = arith.constant 0 : i32
    %36 = vector.broadcast %c0_i32_10 : i32 to vector<16x16xi32>
    %37 = arith.select %29, %35, %36 : vector<16x16xi1>, vector<16x16xi32>
    %38 = arith.addi %27, %37 : vector<16x16xi32>
    %39 = arith.sitofp %38 : vector<16x16xi32> to vector<16x16xbf16>
    %40 = arith.truncf %7 : vector<16x8xf32> to vector<16x8xbf16>
    %41 = arith.extf %40 : vector<16x8xbf16> to vector<16x8xf32>
    %42 = arith.subf %7, %41 : vector<16x8xf32>
    %43 = arith.truncf %42 : vector<16x8xf32> to vector<16x8xbf16>
    %44 = arith.extf %43 : vector<16x8xbf16> to vector<16x8xf32>
    %45 = arith.subf %42, %44 : vector<16x8xf32>
    %46 = arith.truncf %45 : vector<16x8xf32> to vector<16x8xbf16>
    %cst = arith.constant dense<0.000000e+00> : vector<16x8xf32>
    %47 = tpu.matmul %39, %40, %cst {dimension_numbers = #tpu.dot_dimension_numbers<[1], [0], [0], [1], [0, 0, 1, 1], [], []>} : vector<16x16xbf16>, vector<16x8xbf16>, vector<16x8xf32> -> vector<16x8xf32>
    %cst_11 = arith.constant dense<0.000000e+00> : vector<16x8xf32>
    %48 = tpu.matmul %39, %43, %cst_11 {dimension_numbers = #tpu.dot_dimension_numbers<[1], [0], [0], [1], [0, 0, 1, 1], [], []>} : vector<16x16xbf16>, vector<16x8xbf16>, vector<16x8xf32> -> vector<16x8xf32>
    %49 = arith.addf %47, %48 : vector<16x8xf32>
    %cst_12 = arith.constant dense<0.000000e+00> : vector<16x8xf32>
    %50 = tpu.matmul %39, %46, %cst_12 {dimension_numbers = #tpu.dot_dimension_numbers<[1], [0], [0], [1], [0, 0, 1, 1], [], []>} : vector<16x16xbf16>, vector<16x8xbf16>, vector<16x8xf32> -> vector<16x8xf32>
    %51 = arith.addf %49, %50 : vector<16x8xf32>
    %cst_13 = arith.constant 2.000000e-01 : f32
    %52 = vector.broadcast %cst_13 : f32 to vector<16x8xf32>
    %53 = arith.mulf %51, %52 : vector<16x8xf32>
    %c0_14 = arith.constant 0 : index
    %c0_15 = arith.constant 0 : index
    %c0_16 = arith.constant 0 : index
    %54 = vector.load %arg5[%c0_14, %c0_15, %c0_16] : memref<1x16x8xf32, #tpu.memory_space<vmem>>, vector<1x16x8xf32>
    %55 = vector.shape_cast %54 : vector<1x16x8xf32> to vector<16x8xf32>
    %56 = vector.shape_cast %53 : vector<16x8xf32> to vector<1x16x8xf32>
    tpu.vector_store %arg5[%c0_14, %c0_15, %c0_16], %56 {strides = array<i32>} : memref<1x16x8xf32, #tpu.memory_space<vmem>>, vector<1x16x8xf32>,
    %57 = arith.subf %7, %53 : vector<16x8xf32>
    %c0_17 = arith.constant 0 : index
    %c0_18 = arith.constant 0 : index
    %c0_19 = arith.constant 0 : index
    %58 = vector.load %arg4[%c0_17, %c0_18, %c0_19] : memref<1x16x8xf32, #tpu.memory_space<vmem>>, vector<1x16x8xf32>
    %59 = vector.shape_cast %58 : vector<1x16x8xf32> to vector<16x8xf32>
    %60 = vector.shape_cast %57 : vector<16x8xf32> to vector<1x16x8xf32>
    tpu.vector_store %arg4[%c0_17, %c0_18, %c0_19], %60 {strides = array<i32>} : memref<1x16x8xf32, #tpu.memory_space<vmem>>, vector<1x16x8xf32>,
    return
  }
  func.func @transform_0(%arg0: i32, %arg1: i32, %arg2: i32) -> (i32, i32, i32) {
    %c0_i32 = arith.constant 0 : i32
    %c0_i32_0 = arith.constant 0 : i32
    return %arg0, %c0_i32, %arg1 : i32, i32, i32
  }
  func.func @transform_1(%arg0: i32, %arg1: i32, %arg2: i32) -> (i32, i32, i32) {
    %c0_i32 = arith.constant 0 : i32
    return %arg0, %arg2, %arg1 : i32, i32, i32
  }
  func.func @transform_2(%arg0: i32, %arg1: i32, %arg2: i32) -> (i32, i32, i32) {
    %c0_i32 = arith.constant 0 : i32
    return %arg0, %arg2, %arg1 : i32, i32, i32
  }
}

</mosaic_0001>

<bundles_post_ra>
// kernel: tpu_custom_call.1
= control target key start
LH: loop header
LB: loop body
LE: loop exit
PB: predicated region body
PF: predicated region fallthrough
CT: control target
= control target key end

     0   :  { %s716_s9 = smov 0   ;;  %s718_s10 = smov 0   ;;  %s770_s0 = inlined_call_operand.vmem [shape: f32[2,16,8], index: 0, kind: input, shape index: {}]   ;;  %s771_s1 = inlined_call_operand.vmem [shape: f32[2,16,8], index: 1, kind: output, shape index: {0}]   ;;  %s772_s2 = inlined_call_operand.vmem [shape: f32[2,16,8], index: 2, kind: output, shape index: {1}]  }
   0x1   :  { %s720_s11 = smov 0  }
   0x2 LB: > { %s32_s12 = sadd.s32 1, %s692_s10  ;;  %p598_p0 = scmp.ge.s32.totalorder %s696_s11, 1  ;;  %s696_s11 = sphi %s720_s11, %s13_s11   ;;  %s692_s10 = sphi %s718_s10, %s774_s10   ;;  %s688_s9 = sphi %s716_s9, %s773_s9  }
   0x3   : > { %p34_p1 = scmp.ge.s32.totalorder %s32_s12, 2  ;;  %p147_p2 = scmp.lt.s32.totalorder %s696_s11, 3 }
   0x5   : > { %s776_s12 = smov (%p34_p1, %s32_s12), 0  ;;  %p148_p3 = pnand %p598_p0, %p147_p2 }
   0x6   : > { %p191_p4 = scmp.lt.s32.totalorder (!%p148_p3), %s688_s9, 1  ;;  %v235_v0 = vlaneseq (!%p148_p3)  ;;  %v698_v1 = vmov (!%p148_p3), 0.0   ;;  %vm699_vm0 = vmmov (!%p148_p3), 0   ;;  %v700_v23 = vmov (!%p148_p3), 0  }
   0x7   : > { %151 = sbr.rel (%p148_p3) target bundleno = 259 (0x103), region = 24  ;;  %629 = vmatprep.subr.bf16.mxu0 (!%p148_p3), %v698_v1  ;;  %631 = vmatprep.mubr.msk.bf16.mxu0 (!%p148_p3), %vm699_vm0, %v698_v1  ;;  %vm295_vm7 = vcmask (!%p148_p3), 130048   ;;  %vm426_vm8 = vcmask (!%p148_p3), 64512  }
   0x8   : > { %v236_v2 = vshrl.u32 (!%p148_p3), %v235_v0, 7  ;;  %v242_v3 = vand.u32 (!%p148_p3), 127, %v235_v0  ;;  %623 = vmatprep.subr.bf16.mxu1 (!%p148_p3), %v698_v1  ;;  %625 = vmatprep.mubr.msk.bf16.mxu1 (!%p148_p3), %vm699_vm0, %v698_v1 }
   0xa   : > { %v237_v4 = vadd.s32 (!%p148_p3), 8, %v236_v2  ;;  %v245_v5 = vsub.s32 (!%p148_p3), %v236_v2, %v242_v3  ;;  %v258_v6 = vsub.s32 (!%p148_p3), 2, %v236_v2  ;;  %vm257_vm1 = vcmp.eq.s32.totalorder (!%p148_p3), %v242_v3, 0 }
   0xb   : > { %vm268_vm3 = vcmp.eq.s32.totalorder (!%p148_p3), %v242_v3, 15 }
   0xc   : > { %v246_v9 = vsub.s32 (!%p148_p3), %v237_v4, %v242_v3  ;;  %v248_v10 = vsub.s32 (!%p148_p3), 0, %v245_v5  ;;  %vm260_vm2 = vcmp.gt.s32.totalorder (!%p148_p3), %v258_v6, 0  ;;  %v270_v11 = vadd.s32 (!%p148_p3), 2, %v237_v4 }
   0xd   : > { %v261_v13 = vsel (!%p148_p3), %vm260_vm2, %v258_v6, 0 }
   0xe   : > { %s778_s9 = smov (!%p191_p4, %s688_s9), 1  ;;  %v605_v14 = vmin.u32 %v248_v10, %v245_v5  ;;  %v251_v15 = vsub.s32 0, %v246_v9  ;;  %v608_v16 = vadd.s32 4294967281, %v270_v11  ;;  %v264_v19 = vsel %vm257_vm1, %v261_v13, 0 }
   0xf   : > { %s736_s13 = sshll.u32 %s778_s9, 4 }
  0x10   : > { %s198_s16 = scalar_lea.vmem %s770_s0, %s736_s13  ;;  %v606_v20 = vmin.u32 %v251_v15, %v246_v9  ;;  %vm253_vm4 = vcmp.le.s32.totalorder %v605_v14, 2  ;;  %vm275_vm5 = vcmp.gt.s32.totalorder %v608_v16, 0  ;;  %s223_s19 = scalar_lea.vmem %s772_s2, %s736_s13 }
  0x11   : > { %v742_v7 = vld [vmem:[%s198_s16] sm:$0xff]  ;;  %v744_v8 = vld [vmem:[%s198_s16 + $0x8] sm:$0xff]  ;;  %v255_v24 = vsel %vm253_vm4, 1, %v700_v23  ;;  %v276_v25 = vsel %vm275_vm5, %v608_v16, 0  ;;  %s210_s22 = scalar_lea.vmem %s771_s1, %s736_s13 }
  0x12   : > { %v284_v12 = vpack.c.bf16 %v744_v8, %v742_v7  ;;  %vm254_vm6 = vcmp.le.s32.totalorder %v606_v20, 2  ;;  %v266_v26 = vadd.s32 %v264_v19, %v255_v24  ;;  %v278_v27 = vsel %vm268_vm3, %v276_v25, 0 }
  0x13   : > { %v256_v29 = vsel %vm254_vm6, 1, %v700_v23 }
  0x14   : > { %v285_v17 = vunpack.c.l.bf16 %v284_v12  ;;  %v286_v18 = vunpack.c.h.bf16 %v284_v12  ;;  %630 = vmatpush3.bf16.msra.mxu0 %v284_v12  ;;  %v280_v30 = vadd.s32 %v278_v27, %v256_v29  ;;  %v281_v31 = vcvt.s32.f32 %v266_v26 }
  0x15   : > { %635 = vmatprep.subr.bf16.mxu0 %v698_v1 }
  0x16   : > { %v287_v21 = vsub.f32 %v742_v7, %v285_v17  ;;  %v288_v22 = vsub.f32 %v744_v8, %v286_v18  ;;  %v282_v34 = vcvt.s32.f32 %v280_v30 }
  0x18   : > { %v289_v28 = vpack.c.bf16 %v288_v22, %v287_v21  ;;  %v283_v37 = vpack.c.bf16 %v282_v34, %v281_v31 }
  0x1a   : > { %v290_v32 = vunpack.c.l.bf16 %v289_v28  ;;  %v291_v33 = vunpack.c.h.bf16 %v289_v28  ;;  %624 = vmatpush3.bf16.msra.mxu1 %v289_v28  ;;  %632 = vmatmul.mubr.msk.bf16.vlgmr.msra.gmra.mrb[0].mxu0 %vm295_vm7, %v283_v37 }
  0x1b   : > { %637 = vmatprep.mubr.msk.bf16.mxu0 %vm699_vm0, %v698_v1 }
  0x1c   : > { %v292_v35 = vsub.f32 %v287_v21, %v290_v32  ;;  %v293_v36 = vsub.f32 %v288_v22, %v291_v33 }
  0x1d   : > { %626 = vmatmul.mubr.msk.bf16.vlgmr.msra.gmra.mrb[0].mxu1 %vm295_vm7, %v283_v37 }
  0x1e   : > { %v294_v38 = vpack.c.bf16 %v293_v36, %v292_v35 }
  0x20   : > { %636 = vmatpush3.bf16.msra.mxu0 %v294_v38 }
  0x26   : > { %638 = vmatmul.mubr.msk.bf16.vlgmr.msra.gmra.mrb[0].mxu0 %vm295_vm7, %v283_v37 }
  0xf0   : > { %v333_v39 = vpop.f32.mrb[0].mxu1 }
  0xf1   : > { %v627_v40 = vpop.f32.mrb[1].mxu1 }
  0xf2   : > { %v336_v41 = vpop.f32.mrb[2].mxu1 }
  0xf3   : > { %v628_v42 = vpop.f32.mrb[3].mxu1 }
  0xf9   : > { %v415_v43 = vpop.f32.mrb[0].mxu0 }
  0xfa   : > { %v641_v44 = vadd.f32 %v415_v43, %v333_v39  ;;  %v639_v45 = vpop.f32.mrb[1].mxu0 }
  0xfb   : > { %v418_v46 = vpop.f32.mrb[2].mxu0 }
  0xfc   : > { %v424_v47 = vmul.f32 0.2, %v641_v44  ;;  %v642_v48 = vadd.f32 %v418_v46, %v336_v41  ;;  %v640_v49 = vpop.f32.mrb[3].mxu0 }
  0xfe   : > { %427 = vst.msk [vmem:[%s223_s19] sm:$0xff] %vm426_vm8, %v424_v47  ;;  %v429_v50 = vsub.f32 %v742_v7, %v424_v47  ;;  %v425_v51 = vmul.f32 0.2, %v642_v48 }
 0x100   : > { %431 = vst.msk [vmem:[%s210_s22] sm:$0xff] %vm426_vm8, %v429_v50  ;;  %428 = vst.msk [vmem:[%s223_s19 + $0x8] sm:$0xff] %vm426_vm8, %v425_v51  ;;  %v430_v52 = vsub.f32 %v744_v8, %v425_v51 }
 0x102   : > { %432 = vst.msk [vmem:[%s210_s22 + $0x8] sm:$0xff] %vm426_vm8, %v430_v52 }
 0x103 PF: > { %s13_s11 = sadd.s32 1, %s696_s11   ;;  %s773_s9 = smov %s692_s10 }
 0x104   : > { %p10_p5 = scmp.ge.s32.totalorder %s13_s11, 4   ;;  %s774_s10 = smov %s776_s12 }
 0x106   :  { %12 = sbr.rel (!%p10_p5) target bundleno = 2 (0x2), region = 67 }

</bundles_post_ra>
